<compile_context>
chip_gen: v6e
topology: v6e:2x2x1
jax: 0.10.0
libtpu: 0.0.40
codegen_flags: <defaults>
</compile_context>

<pallas_src>
import functools

import jax
import jax.numpy as jnp
from jax import lax
from jax.experimental import pallas as pl
from jax.experimental.pallas import tpu as pltpu


def _round_up(x, m):
    return (x + m - 1) // m * m


# ------------------------------ Pallas kernel --------------------------------

def parity_pool_kernel(x_ref, out_ref, acc_ref):
    """grid = (N, H_tiles).

    x_ref   : (1, T_h, W, C_pad) bf16 tile of the NHWC input (T_h even).
    out_ref : (1, 4, C_pad) f32, written once per image at the last row tile:
              out[0, 2*rp + cp, c] = sum_{i%2==rp, j%2==cp} x[i, j, c].
    acc_ref : (2, W, C_pad) f32 scratch — per-column row-parity partial sums.
    """
    hi = pl.program_id(1)

    @pl.when(hi == 0)
    def _init():
        acc_ref[...] = jnp.zeros_like(acc_ref)

    t = x_ref[0].astype(jnp.float32)                       # [T_h, W, C_pad]
    th, w, c = t.shape
    # Row-parity partial sums: reduction along the *outer* dim only (plain vreg
    # adds, no cross-lane/sublane work per step).  T_h is even, so local row
    # parity == global row parity; zero-padded rows contribute nothing.
    acc_ref[...] += jnp.sum(t.reshape(th // 2, 2, w, c), axis=0)

    @pl.when(hi == pl.num_programs(1) - 1)
    def _finalize():
        a = acc_ref[...]                                   # [2, W, C_pad]
        col = lax.broadcasted_iota(jnp.int32, (1, w, 1), 1)
        even = (col % 2 == 0).astype(jnp.float32)          # [1, W, 1]
        odd = 1.0 - even
        # Single cross-sublane reduce per image (not per step).
        out_ref[0, 0:1, :] = jnp.sum(a[0:1] * even, axis=1)   # rows even, cols even
        out_ref[0, 1:2, :] = jnp.sum(a[0:1] * odd,  axis=1)   # rows even, cols odd
        out_ref[0, 2:3, :] = jnp.sum(a[1:2] * even, axis=1)   # rows odd,  cols even
        out_ref[0, 3:4, :] = jnp.sum(a[1:2] * odd,  axis=1)   # rows odd,  cols odd


# --------------------------------- wrapper ------------------------------------

@functools.partial(jax.jit, static_argnames=("tile_h",))
def model_forward(feat, params, *, tile_h=None):
    """feat: [N, C_in, H, W] float32 (NCHW). Returns logits [N, num_classes]."""
    N, C_in, H, W = feat.shape
    Ho, Wo = (H + 1) // 2, (W + 1) // 2                    # k=3/s=2/p=1 output size
    P = Ho * Wo

    w1, wa, wb, gamma, beta, mean, var, wc, bc = params

    # ---------------- tile-size / padding choices ----------------
    C_pad = _round_up(C_in, 128)                           # lane dim
    if tile_h is None:
        # target ~1 MB bf16 per block so the per-step DMA amortizes grid overhead
        bytes_per_row = W * C_pad * 2
        tile_h = max(2, min(_round_up(H, 2), (1 << 20) // max(1, bytes_per_row)))
    tile_h = max(2, tile_h - (tile_h % 2))                 # even -> parity-aligned tiles
    tile_h = min(tile_h, _round_up(H, 2))
    H_pad = _round_up(H, tile_h)

    # ---------------- kernel input: NHWC bf16, C on 128 lanes ----------------
    # (cast first so the transpose/pad copies move bf16, not f32; no 9x im2col)
    x = feat.astype(jnp.bfloat16).transpose(0, 2, 3, 1)    # [N, H, W, C_in]
    x = jnp.pad(x, ((0, 0), (0, H_pad - H), (0, 0), (0, C_pad - C_in)))

    pp = pl.pallas_call(
        parity_pool_kernel,
        out_shape=jax.ShapeDtypeStruct((N, 4, C_pad), jnp.float32),
        grid=(N, H_pad // tile_h),
        in_specs=[pl.BlockSpec((1, tile_h, W, C_pad), lambda n, h: (n, h, 0, 0))],
        out_specs=pl.BlockSpec((1, 4, C_pad), lambda n, h: (n, 0, 0)),
        scratch_shapes=[pltpu.VMEM((2, W, C_pad), jnp.float32)],
        compiler_params=pltpu.CompilerParams(
            dimension_semantics=("parallel", "arbitrary")),
    )(x)
    pp = pp[:, :, :C_in]                                   # [N, 4, C_in]

    # ------- per-tap pooled patch sums (exact, O(H+W) corrections in XLA) -------
    # pp[:, 2*rp + cp, :] = sum_{i%2==rp, j%2==cp} feat[:, :, i, j]
    # Padded-parity sum for tap parities (a, b):
    def S(a, b):
        return pp[:, 2 * (1 - a) + (1 - b), :]             # [N, C_in]

    row_corr = (H % 2 == 0)                                # padded row 2*Ho is real data
    col_corr = (W % 2 == 0)                                # padded col 2*Wo is real data
    if row_corr:
        last_row = feat[:, :, H - 1, :]                    # [N, C_in, W]
        cp = [jnp.sum(last_row[:, :, 1::2], axis=-1),      # padded-col parity 0
              jnp.sum(last_row[:, :, 0::2], axis=-1)]      # padded-col parity 1
    if col_corr:
        last_col = feat[:, :, :, W - 1]                    # [N, C_in, H]
        rp = [jnp.sum(last_col[:, :, 1::2], axis=-1),      # padded-row parity 0
              jnp.sum(last_col[:, :, 0::2], axis=-1)]      # padded-row parity 1
    if row_corr and col_corr:
        corner = feat[:, :, H - 1, W - 1]                  # [N, C_in]

    taps = []
    for kh in range(3):
        for kw in range(3):
            t = S(kh % 2, kw % 2)
            if kh == 0 and row_corr:
                t = t - cp[kw % 2]
            if kw == 0 and col_corr:
                t = t - rp[kh % 2]
            if kh == 0 and kw == 0 and row_corr and col_corr:
                t = t + corner
            taps.append(t)
    # K ordering matches the torch conv-weight reshape: k = c*9 + kh*3 + kw
    s_flat = jnp.stack(taps, axis=-1).reshape(N, C_in * 9)          # [N, K]

    # ---------------- folded epilogue (tiny GEMMs, left to XLA/MXU) ----------------
    w_eff = w1 + wa @ wb                                   # exact LoRA fold  [K, C_out]
    scale = gamma.reshape(-1) * lax.rsqrt(var.reshape(-1) + 1e-5)
    shift = beta.reshape(-1) - mean.reshape(-1) * scale
    pooled = (s_flat @ w_eff) * (scale / P) + shift        # conv + BN(eval) + avg-pool
    return pooled @ wc + bc                                # classifier


# --------------------------- reference (plain JAX) ----------------------------

def reference_forward(feat, params):
    """Plain-JAX f32 reference following the module op order exactly."""
    w1, wa, wb, gamma, beta, mean, var, wc, bc = params
    N, C_in, H, W = feat.shape
    C_out = w1.shape[1]
    rank = wa.shape[1]
    dn = lax.conv_dimension_numbers(feat.shape, (C_out, C_in, 3, 3),
                                    ('NCHW', 'OIHW', 'NCHW'))
    w1_oihw = w1.T.reshape(C_out, C_in, 3, 3)
    wa_oihw = wa.T.reshape(rank, C_in, 3, 3)
    wb_oihw = wb.T.reshape(C_out, rank, 1, 1)
    y = lax.conv_general_dilated(feat, w1_oihw, (2, 2), ((1, 1), (1, 1)),
                                 dimension_numbers=dn)                 # layer1
    ya = lax.conv_general_dilated(feat, wa_oihw, (2, 2), ((1, 1), (1, 1)),
                                  dimension_numbers=dn)                # lora_A
    yb = lax.conv_general_dilated(ya, wb_oihw, (1, 1), ((0, 0), (0, 0)),
                                  dimension_numbers=dn)                # lora_B
    y = y + yb
    s = gamma.reshape(1, -1, 1, 1) * lax.rsqrt(var.reshape(1, -1, 1, 1) + 1e-5)
    y = (y - mean.reshape(1, -1, 1, 1)) * s + beta.reshape(1, -1, 1, 1)  # BN eval
    pooled = jnp.mean(y, axis=(2, 3))                      # adaptive_avg_pool2d((1,1))
    return pooled @ wc + bc


# ------------------------- deterministic parameters ---------------------------

def init_params(key, C_in, C_out, rank, num_classes):
    ks = jax.random.split(key, 8)
    K = C_in * 9
    # layer1 conv weight: torch layout [C_out, C_in, 3, 3] -> [K, C_out]
    w1_t = 0.1 * jax.random.normal(ks[0], (C_out, C_in, 3, 3), jnp.float32)
    w1 = w1_t.reshape(C_out, K).T
    # lora_A conv weight: [rank, C_in, 3, 3] -> [K, rank]
    wa_t = 0.1 * jax.random.normal(ks[1], (rank, C_in, 3, 3), jnp.float32)
    wa = wa_t.reshape(rank, K).T
    # lora_B conv weight: zero-initialized (nn.init.constant_(..., 0))
    wb = jnp.zeros((rank, C_out), jnp.float32)
    # BatchNorm2d(C_out) eval-mode params
    gamma = 1.0 + 0.05 * jax.random.normal(ks[2], (1, C_out), jnp.float32)
    beta = 0.05 * jax.random.normal(ks[3], (1, C_out), jnp.float32)
    mean = 0.1 * jax.random.normal(ks[4], (1, C_out), jnp.float32)
    var = jnp.abs(jax.random.normal(ks[5], (1, C_out), jnp.float32)) + 0.5
    # classifier Linear: torch weight [num_classes, C_out] -> pass its transpose
    wc_t = 0.1 * jax.random.normal(ks[6], (num_classes, C_out), jnp.float32)
    wc = wc_t.T
    bc = 0.05 * jax.random.normal(ks[7], (1, num_classes), jnp.float32)
    return (w1, wa, wb, gamma, beta, mean, var, wc, bc)


if __name__ == "__main__":
    key = jax.random.PRNGKey(0)
    k_feat, k_params, k_feat2, k_params2 = jax.random.split(key, 4)

    # ---- primary test: even H/W (boundary-correction path), multi-step grid ----
    N, C_in, H, W = 2, 4, 16, 16
    rank, C_out, num_classes = 4, 8, 10
    feat = jax.random.normal(k_feat, (N, C_in, H, W), jnp.float32)
    params = init_params(k_params, C_in, C_out, rank, num_classes)

    # tile_h=8 -> grid=(2, 2): exercises the multi-step accumulator path.
    out = model_forward(feat, params, tile_h=8)
    out = jax.block_until_ready(out)
    assert out.shape == (N, num_classes)
    ref = reference_forward(feat, params)
    assert bool(jnp.allclose(out, ref, rtol=1e-2, atol=1e-2)), \
        "kernel output mismatch vs reference (even H/W)"

    # ---- secondary test: odd H/W (no corrections) + zero-padded row tiles ----
    N2, C_in2, H2, W2 = 1, 3, 15, 15
    feat2 = jax.random.normal(k_feat2, (N2, C_in2, H2, W2), jnp.float32)
    params2 = init_params(k_params2, C_in2, 8, 2, 5)
    out2 = jax.block_until_ready(model_forward(feat2, params2, tile_h=6))
    ref2 = reference_forward(feat2, params2)
    assert bool(jnp.allclose(out2, ref2, rtol=1e-2, atol=1e-2)), \
        "kernel output mismatch vs reference (odd H/W)"

    print("KERNEL_OK")
</pallas_src>

<mosaic_0001>
module attributes {stable_mosaic.version = 11 : i64} {
  func.func @parity_pool_kernel(%arg0: i32, %arg1: i32, %arg2: memref<1x8x16x128xbf16, #tpu.memory_space<vmem>>, %arg3: memref<1x4x128xf32, #tpu.memory_space<vmem>>, %arg4: memref<2x16x128xf32, #tpu.memory_space<vmem>>) attributes {dimension_semantics = [#tpu.dimension_semantics<parallel>, #tpu.dimension_semantics<arbitrary>], iteration_bounds = array<i64: 2, 2>, scalar_prefetch = 0 : i64, scratch_operands = 1 : i64, tpu.core_type = #tpu.core_type<tc>, window_params = [{transform_indices = @transform_0, window_bounds = array<i64: 1, 8, 16, 128>}, {transform_indices = @transform_1, window_bounds = array<i64: 1, 4, 128>}]} {
    %c0_i32 = arith.constant 0 : i32
    %0 = arith.cmpi eq, %arg1, %c0_i32 : i32
    %1 = arith.extui %0 : i1 to i32
    %c0_i32_0 = arith.constant 0 : i32
    %2 = arith.cmpi ne, %1, %c0_i32_0 : i32
    scf.if %2 {
      %cst_11 = arith.constant 0.000000e+00 : f32
      %14 = vector.broadcast %cst_11 : f32 to vector<2x16x128xf32>
      %c0_12 = arith.constant 0 : index
      %c0_13 = arith.constant 0 : index
      %c0_14 = arith.constant 0 : index
      %15 = vector.load %arg4[%c0_12, %c0_13, %c0_14] : memref<2x16x128xf32, #tpu.memory_space<vmem>>, vector<2x16x128xf32>
      tpu.vector_store %arg4[%c0_12, %c0_13, %c0_14], %14 {strides = array<i32>} : memref<2x16x128xf32, #tpu.memory_space<vmem>>, vector<2x16x128xf32>,
    } else {
    }
    %c0 = arith.constant 0 : index
    %c0_1 = arith.constant 0 : index
    %c0_2 = arith.constant 0 : index
    %c0_3 = arith.constant 0 : index
    %3 = vector.load %arg2[%c0, %c0_1, %c0_2, %c0_3] : memref<1x8x16x128xbf16, #tpu.memory_space<vmem>>, vector<1x8x16x128xbf16>
    %4 = vector.shape_cast %3 : vector<1x8x16x128xbf16> to vector<8x16x128xbf16>
    %5 = arith.extf %4 : vector<8x16x128xbf16> to vector<8x16x128xf32>
    %c0_4 = arith.constant 0 : index
    %c0_5 = arith.constant 0 : index
    %c0_6 = arith.constant 0 : index
    %6 = vector.load %arg4[%c0_4, %c0_5, %c0_6] : memref<2x16x128xf32, #tpu.memory_space<vmem>>, vector<2x16x128xf32>
    %7 = vector.shape_cast %5 : vector<8x16x128xf32> to vector<4x2x16x128xf32>
    %cst = arith.constant dense<0.000000e+00> : vector<2x16x128xf32>
    %8 = vector.multi_reduction <add>, %7, %cst [0] : vector<4x2x16x128xf32> to vector<2x16x128xf32>
    %9 = arith.addf %6, %8 : vector<2x16x128xf32>
    %c0_7 = arith.constant 0 : index
    %c0_8 = arith.constant 0 : index
    %c0_9 = arith.constant 0 : index
    %10 = vector.load %arg4[%c0_7, %c0_8, %c0_9] : memref<2x16x128xf32, #tpu.memory_space<vmem>>, vector<2x16x128xf32>
    tpu.vector_store %arg4[%c0_7, %c0_8, %c0_9], %9 {strides = array<i32>} : memref<2x16x128xf32, #tpu.memory_space<vmem>>, vector<2x16x128xf32>,
    %c1_i32 = arith.constant 1 : i32
    %11 = arith.cmpi eq, %arg1, %c1_i32 : i32
    %12 = arith.extui %11 : i1 to i32
    %c0_i32_10 = arith.constant 0 : i32
    %13 = arith.cmpi ne, %12, %c0_i32_10 : i32
    scf.if %13 {
      %c0_11 = arith.constant 0 : index
      %c0_12 = arith.constant 0 : index
      %c0_13 = arith.constant 0 : index
      %14 = vector.load %arg4[%c0_11, %c0_12, %c0_13] : memref<2x16x128xf32, #tpu.memory_space<vmem>>, vector<2x16x128xf32>
      %15 = tpu.iota {dimensions = array<i32: 1>} : vector<1x16x1xi32>
      %c2_i32 = arith.constant 2 : i32
      %c0_i32_14 = arith.constant 0 : i32
      %16 = arith.cmpi eq, %c2_i32, %c0_i32_14 : i32
      %c1_i32_15 = arith.constant 1 : i32
      %17 = arith.select %16, %c1_i32_15, %c2_i32 : i32
      %18 = vector.broadcast %17 : i32 to vector<1x16x1xi32>
      %19 = arith.remsi %15, %18 : vector<1x16x1xi32>
      %c0_i32_16 = arith.constant 0 : i32
      %20 = vector.broadcast %c0_i32_16 : i32 to vector<1x16x1xi32>
      %21 = arith.cmpi ne, %19, %20 : vector<1x16x1xi32>
      %c0_i32_17 = arith.constant 0 : i32
      %22 = vector.broadcast %c0_i32_17 : i32 to vector<1x16x1xi32>
      %23 = arith.cmpi slt, %19, %22 : vector<1x16x1xi32>
      %c0_i32_18 = arith.constant 0 : i32
      %24 = arith.cmpi slt, %17, %c0_i32_18 : i32
      %25 = vector.broadcast %24 : i1 to vector<1x16x1xi1>
      %26 = vector.broadcast %25 : vector<1x16x1xi1> to vector<1x16x1xi1>
      %27 = arith.xori %23, %26 : vector<1x16x1xi1>
      %28 = arith.andi %27, %21 : vector<1x16x1xi1>
      %29 = vector.broadcast %17 : i32 to vector<1x16x1xi32>
      %30 = arith.addi %19, %29 : vector<1x16x1xi32>
      %31 = arith.select %28, %30, %19 : vector<1x16x1xi1>, vector<1x16x1xi32>
      %c0_i32_19 = arith.constant 0 : i32
      %32 = vector.broadcast %c0_i32_19 : i32 to vector<1x16x1xi32>
      %33 = arith.cmpi eq, %31, %32 : vector<1x16x1xi32>
      %34 = arith.extui %33 : vector<1x16x1xi1> to vector<1x16x1xi32>
      %35 = arith.sitofp %34 : vector<1x16x1xi32> to vector<1x16x1xf32>
      %cst_20 = arith.constant 1.000000e+00 : f32
      %36 = vector.broadcast %cst_20 : f32 to vector<1x16x1xf32>
      %37 = arith.subf %36, %35 : vector<1x16x1xf32>
      %38 = vector.extract_strided_slice %14 {offsets = [0, 0, 0], sizes = [1, 16, 128], strides = [1, 1, 1]} : vector<2x16x128xf32> to vector<1x16x128xf32>
      %39 = vector.broadcast %35 : vector<1x16x1xf32> to vector<1x16x128xf32>
      %40 = arith.mulf %38, %39 : vector<1x16x128xf32>
      %cst_21 = arith.constant dense<0.000000e+00> : vector<1x128xf32>
      %41 = vector.multi_reduction <add>, %40, %cst_21 [1] : vector<1x16x128xf32> to vector<1x128xf32>
      %c0_22 = arith.constant 0 : index
      %c0_23 = arith.constant 0 : index
      %c0_24 = arith.constant 0 : index
      %42 = vector.load %arg3[%c0_22, %c0_23, %c0_24] : memref<1x4x128xf32, #tpu.memory_space<vmem>>, vector<1x1x128xf32>
      %43 = vector.shape_cast %42 : vector<1x1x128xf32> to vector<1x128xf32>
      %44 = vector.shape_cast %41 : vector<1x128xf32> to vector<1x1x128xf32>
      tpu.vector_store %arg3[%c0_22, %c0_23, %c0_24], %44 {strides = array<i32>} : memref<1x4x128xf32, #tpu.memory_space<vmem>>, vector<1x1x128xf32>,
      %45 = vector.extract_strided_slice %14 {offsets = [0, 0, 0], sizes = [1, 16, 128], strides = [1, 1, 1]} : vector<2x16x128xf32> to vector<1x16x128xf32>
      %46 = vector.broadcast %37 : vector<1x16x1xf32> to vector<1x16x128xf32>
      %47 = arith.mulf %45, %46 : vector<1x16x128xf32>
      %cst_25 = arith.constant dense<0.000000e+00> : vector<1x128xf32>
      %48 = vector.multi_reduction <add>, %47, %cst_25 [1] : vector<1x16x128xf32> to vector<1x128xf32>
      %c0_26 = arith.constant 0 : index
      %c1 = arith.constant 1 : index
      %c0_27 = arith.constant 0 : index
      %49 = vector.load %arg3[%c0_26, %c1, %c0_27] : memref<1x4x128xf32, #tpu.memory_space<vmem>>, vector<1x1x128xf32>
      %50 = vector.shape_cast %49 : vector<1x1x128xf32> to vector<1x128xf32>
      %51 = vector.shape_cast %48 : vector<1x128xf32> to vector<1x1x128xf32>
      tpu.vector_store %arg3[%c0_26, %c1, %c0_27], %51 {strides = array<i32>} : memref<1x4x128xf32, #tpu.memory_space<vmem>>, vector<1x1x128xf32>,
      %52 = vector.extract_strided_slice %14 {offsets = [1, 0, 0], sizes = [1, 16, 128], strides = [1, 1, 1]} : vector<2x16x128xf32> to vector<1x16x128xf32>
      %53 = vector.broadcast %35 : vector<1x16x1xf32> to vector<1x16x128xf32>
      %54 = arith.mulf %52, %53 : vector<1x16x128xf32>
      %cst_28 = arith.constant dense<0.000000e+00> : vector<1x128xf32>
      %55 = vector.multi_reduction <add>, %54, %cst_28 [1] : vector<1x16x128xf32> to vector<1x128xf32>
      %c0_29 = arith.constant 0 : index
      %c2 = arith.constant 2 : index
      %c0_30 = arith.constant 0 : index
      %56 = vector.load %arg3[%c0_29, %c2, %c0_30] : memref<1x4x128xf32, #tpu.memory_space<vmem>>, vector<1x1x128xf32>
      %57 = vector.shape_cast %56 : vector<1x1x128xf32> to vector<1x128xf32>
      %58 = vector.shape_cast %55 : vector<1x128xf32> to vector<1x1x128xf32>
      tpu.vector_store %arg3[%c0_29, %c2, %c0_30], %58 {strides = array<i32>} : memref<1x4x128xf32, #tpu.memory_space<vmem>>, vector<1x1x128xf32>,
      %59 = vector.extract_strided_slice %14 {offsets = [1, 0, 0], sizes = [1, 16, 128], strides = [1, 1, 1]} : vector<2x16x128xf32> to vector<1x16x128xf32>
      %60 = vector.broadcast %37 : vector<1x16x1xf32> to vector<1x16x128xf32>
      %61 = arith.mulf %59, %60 : vector<1x16x128xf32>
      %cst_31 = arith.constant dense<0.000000e+00> : vector<1x128xf32>
      %62 = vector.multi_reduction <add>, %61, %cst_31 [1] : vector<1x16x128xf32> to vector<1x128xf32>
      %c0_32 = arith.constant 0 : index
      %c3 = arith.constant 3 : index
      %c0_33 = arith.constant 0 : index
      %63 = vector.load %arg3[%c0_32, %c3, %c0_33] : memref<1x4x128xf32, #tpu.memory_space<vmem>>, vector<1x1x128xf32>
      %64 = vector.shape_cast %63 : vector<1x1x128xf32> to vector<1x128xf32>
      %65 = vector.shape_cast %62 : vector<1x128xf32> to vector<1x1x128xf32>
      tpu.vector_store %arg3[%c0_32, %c3, %c0_33], %65 {strides = array<i32>} : memref<1x4x128xf32, #tpu.memory_space<vmem>>, vector<1x1x128xf32>,
    } else {
    }
    return
  }
  func.func @transform_0(%arg0: i32, %arg1: i32) -> (i32, i32, i32, i32) {
    %c0_i32 = arith.constant 0 : i32
    %c0_i32_0 = arith.constant 0 : i32
    %c0_i32_1 = arith.constant 0 : i32
    return %arg0, %arg1, %c0_i32, %c0_i32_0 : i32, i32, i32, i32
  }
  func.func @transform_1(%arg0: i32, %arg1: i32) -> (i32, i32, i32) {
    %c0_i32 = arith.constant 0 : i32
    %c0_i32_0 = arith.constant 0 : i32
    %c0_i32_1 = arith.constant 0 : i32
    return %arg0, %c0_i32, %c0_i32_0 : i32, i32, i32
  }
}

</mosaic_0001>

<bundles_post_ra>
// kernel: model_forward.1
= control target key start
LH: loop header
LB: loop body
LE: loop exit
PB: predicated region body
PF: predicated region fallthrough
CT: control target
= control target key end

     0   :  { %s515_s6 = smov 0   ;;  %s517_s7 = smov 0   ;;  %s577_s0 = inlined_call_operand.vmem [shape: bf16[2,16,16,128], index: 0, kind: input, shape index: {}]   ;;  %s578_s1 = inlined_call_operand.vmem [shape: f32[2,4,128], index: 1, kind: output, shape index: {}]  }
   0x1   :  { %s519_s8 = smov 0   ;;  %s521_s9 = smov 0  }
   0x2   :  { %s523_s10 = smov 0  }
   0x3 LB: > { %s20_s11 = sadd.s32 1, %s493_s8  ;;  %s23_s12 = sadd.s32 1, %s497_s9  ;;  %s501_s10 = sphi %s523_s10, %s11_s10   ;;  %s497_s9 = sphi %s521_s9, %s582_s9   ;;  %s493_s8 = sphi %s519_s8, %s581_s8   ;;  %s489_s7 = sphi %s517_s7, %s580_s7   ;;  %s485_s6 = sphi %s515_s6, %s579_s6  }
   0x4   : > { %p21_p0 = scmp.ge.s32.totalorder %s20_s11, 2  ;;  %p370_p1 = scmp.ge.s32.totalorder %s501_s10, 1 }
   0x5   : > { %p107_p2 = scmp.lt.s32.totalorder %s501_s10, 5 }
   0x6   : > { %s584_s11 = smov (%p21_p0, %s20_s11), 0  ;;  %s586_s12 = smov (!%p21_p0, %s23_s12), %s497_s9 }
   0x7   : > { %p108_p3 = pnand %p370_p1, %p107_p2  ;;  %p25_p4 = scmp.ge.s32.totalorder %s586_s12, 2 }
   0x8   : > { %s371_s13 = sshll.u32 (!%p108_p3), %s485_s6, 3  ;;  %p132_p5 = scmp.lt.s32.totalorder (!%p108_p3), %s489_s7, 1 }
   0x9   : > { %s588_s12 = smov (%p25_p4, %s586_s12), 0  ;;  %111 = sbr.rel (%p108_p3) target bundleno = 69 (0x45), region = 24 }
   0xa   : > { %p134_p6 = scmp.lt.s32.totalorder (!%p108_p3), %s371_s13, 15  ;;  %p376_p7 = scmp.ne.s32.totalorder (!%p108_p3), %s485_s6, 0 }
   0xe   : > { %s590_s7 = smov (!%p132_p5, %s489_s7), 1  ;;  %s592_s13 = smov (!%p134_p6, %s371_s13), 15 }
   0xf   : > { %s373_s14 = sshll.u32 %s590_s7, 5  ;;  %s375_s15 = sshll.u32 %s590_s7, 2 }
  0x10   : > { %s372_s16 = sshll.u32 %s592_s13, 1  ;;  %s551_s19 = scalar_lea.vmem %s578_s1, %s375_s15 }
  0x11   : > { %s138_s20 = sadd.s32 %s373_s14, %s372_s16  ;;  %149 = sbr.rel (%p376_p7) target bundleno = 25 (0x19), region = 28 }
  0x12   : > { %s374_s21 = sshll.u32 %s138_s20, 2 }
  0x13   : > { %s140_s24 = scalar_lea.vmem %s577_s0, %s374_s21 }
  0x16   : > { %v503_v0 = vmov 0.0  }
  0x17   : > { %150 = vst [vmem:[#allocation2 + $0x10] sm:$0xff] %v503_v0  ;;  %151 = vst [vmem:[#allocation2] sm:$0xff] %v503_v0 }
  0x18   : > { %152 = vst [vmem:[#allocation2 + $0x18] sm:$0xff] %v503_v0  ;;  %153 = vst [vmem:[#allocation2 + $0x8] sm:$0xff] %v503_v0 }
  0x19 PF: > { %v383_v1 = vld [vmem:[%s140_s24] sm:$0xff]   ;;  %v415_v2 = vld [vmem:[%s140_s24 + $0x10] sm:$0xff]   ;;  %v414_v12 = vld [vmem:[%s140_s24 + $0x8] sm:$0xff]   ;;  %p377_p8 = scmp.ne.s32.totalorder %s485_s6, 1 }
  0x1a   : > { %v417_v3 = vld [vmem:[%s140_s24 + $0x20] sm:$0xff]   ;;  %v384_v4 = vunpack.c.l.bf16 %v383_v1  ;;  %v392_v5 = vunpack.c.l.bf16 %v415_v2  ;;  %v419_v7 = vld [vmem:[%s140_s24 + $0x30] sm:$0xff]   ;;  %v385_v8 = vunpack.c.h.bf16 %v383_v1  ;;  %v393_v10 = vunpack.c.h.bf16 %v415_v2  ;;  %v416_v13 = vld [vmem:[%s140_s24 + $0x18] sm:$0xff]  }
  0x1b   : > { %v400_v6 = vunpack.c.l.bf16 %v417_v3  ;;  %v408_v9 = vunpack.c.l.bf16 %v419_v7  ;;  %v401_v11 = vunpack.c.h.bf16 %v417_v3  ;;  %v418_v14 = vld [vmem:[%s140_s24 + $0x28] sm:$0xff]   ;;  %v388_v16 = vunpack.c.l.bf16 %v414_v12  ;;  %v420_v19 = vld [vmem:[%s140_s24 + $0x38] sm:$0xff]  }
  0x1c   : > { %v190_v15 = vadd.f32 %v392_v5, %v384_v4  ;;  %v396_v17 = vunpack.c.l.bf16 %v416_v13  ;;  %v404_v18 = vunpack.c.l.bf16 %v418_v14  ;;  %v409_v20 = vunpack.c.h.bf16 %v419_v7 }
  0x1d   : > { %v193_v21 = vadd.f32 %v393_v10, %v385_v8  ;;  %v389_v22 = vunpack.c.h.bf16 %v414_v12  ;;  %v397_v23 = vunpack.c.h.bf16 %v416_v13  ;;  %v412_v25 = vunpack.c.l.bf16 %v420_v19 }
  0x1e   : > { %v191_v24 = vadd.f32 %v400_v6, %v190_v15  ;;  %v196_v26 = vadd.f32 %v396_v17, %v388_v16  ;;  %v405_v27 = vunpack.c.h.bf16 %v418_v14  ;;  %v186_v28 = vld [vmem:[#allocation2 + $0x10] sm:$0xff]  ;;  %v413_v30 = vunpack.c.h.bf16 %v420_v19  ;;  %v187_v33 = vld [vmem:[#allocation2] sm:$0xff] }
  0x1f   : > { %v194_v29 = vadd.f32 %v401_v11, %v193_v21  ;;  %v199_v31 = vadd.f32 %v397_v23, %v389_v22  ;;  %v188_v36 = vld [vmem:[#allocation2 + $0x18] sm:$0xff]  ;;  %v189_v40 = vld [vmem:[#allocation2 + $0x8] sm:$0xff] }
  0x20   : > { %v192_v32 = vadd.f32 %v408_v9, %v191_v24  ;;  %v197_v34 = vadd.f32 %v404_v18, %v196_v26 }
  0x21   : > { %v195_v35 = vadd.f32 %v409_v20, %v194_v29  ;;  %v200_v37 = vadd.f32 %v405_v27, %v199_v31 }
  0x22   : > { %v202_v38 = vadd.f32 %v192_v32, %v186_v28  ;;  %v198_v39 = vadd.f32 %v412_v25, %v197_v34 }
  0x23   : > { %v203_v41 = vadd.f32 %v195_v35, %v187_v33  ;;  %v201_v42 = vadd.f32 %v413_v30, %v200_v37  ;;  %213 = sbr.rel (%p377_p8) target bundleno = 69 (0x45), region = 32 }
  0x24   : > { %206 = vst [vmem:[#allocation2 + $0x10] sm:$0xff] %v202_v38  ;;  %v204_v43 = vadd.f32 %v198_v39, %v188_v36 }
  0x25   : > { %207 = vst [vmem:[#allocation2] sm:$0xff] %v203_v41  ;;  %v205_v44 = vadd.f32 %v201_v42, %v189_v40 }
  0x26   : > { %208 = vst [vmem:[#allocation2 + $0x18] sm:$0xff] %v204_v43 }
  0x27   : > { %209 = vst [vmem:[#allocation2 + $0x8] sm:$0xff] %v205_v44 }
  0x28   : > { %v218_v45 = vlaneseq  ;;  %v504_v53 = vmov 0.0  }
  0x2a   : > { %v219_v46 = vshrl.u32 %v218_v45, 7 }
  0x2b   : > { %v214_v49 = vld [vmem:[#allocation2 + $0x10] sm:$0xff] }
  0x2c   : > { %v220_v47 = vadd.s32 8, %v219_v46  ;;  %v225_v48 = vand.u32 1, %v219_v46  ;;  %v215_v52 = vld [vmem:[#allocation2] sm:$0xff] }
  0x2d   : > { %v216_v50 = vld [vmem:[#allocation2 + $0x18] sm:$0xff] }
  0x2e   : > { %v232_v51 = vand.u32 1, %v220_v47  ;;  %vm245_vm0 = vcmp.eq.s32.totalorder %v225_v48, 0  ;;  %v217_v55 = vld [vmem:[#allocation2 + $0x8] sm:$0xff] }
  0x2f   : > { %v378_v54 = vsel %vm245_vm0, 1.0, %v504_v53 }
  0x30   : > { %vm246_vm1 = vcmp.eq.s32.totalorder %v232_v51, 0  ;;  %v253_v56 = vmul.f32 %v378_v54, %v214_v49  ;;  %v251_v57 = vsub.f32 1.0, %v378_v54  ;;  %v273_v58 = vmul.f32 %v378_v54, %v216_v50 }
  0x31   : > { %v379_v59 = vsel %vm246_vm1, 1.0, %v504_v53 }
  0x32   : > { %v254_v60 = vmul.f32 %v379_v59, %v215_v52  ;;  %v252_v61 = vsub.f32 1.0, %v379_v59  ;;  %v263_v62 = vmul.f32 %v251_v57, %v214_v49  ;;  %v274_v63 = vmul.f32 %v379_v59, %v217_v55 }
  0x33   : > { %v283_v0 = vmul.f32 %v251_v57, %v216_v50 }
  0x34   : > { %v255_v1 = vadd.f32 %v254_v60, %v253_v56  ;;  %v264_v2 = vmul.f32 %v252_v61, %v215_v52  ;;  %v275_v3 = vadd.f32 %v274_v63, %v273_v58  ;;  %v284_v4 = vmul.f32 %v252_v61, %v217_v55 }
  0x36   : > { %v256_v5 = vrot.slane %v255_v1, 4  ;;  %v265_v6 = vadd.f32 %v264_v2, %v263_v62  ;;  %v276_v7 = vrot.slane %v275_v3, 4  ;;  %v285_v8 = vadd.f32 %v284_v4, %v283_v0 }
  0x38   : > { %v257_v9 = vadd.f32 %v256_v5, %v255_v1  ;;  %v266_v10 = vrot.slane %v265_v6, 4  ;;  %v277_v11 = vadd.f32 %v276_v7, %v275_v3  ;;  %v286_v12 = vrot.slane %v285_v8, 4 }
  0x3a   : > { %v258_v13 = vrot.slane %v257_v9, 2  ;;  %v267_v14 = vadd.f32 %v266_v10, %v265_v6  ;;  %v278_v15 = vrot.slane %v277_v11, 2  ;;  %v287_v16 = vadd.f32 %v286_v12, %v285_v8 }
  0x3c   : > { %v259_v17 = vadd.f32 %v258_v13, %v257_v9  ;;  %v268_v18 = vrot.slane %v267_v14, 2  ;;  %v279_v19 = vadd.f32 %v278_v15, %v277_v11  ;;  %v288_v20 = vrot.slane %v287_v16, 2 }
  0x3e   : > { %v260_v21 = vrot.slane %v259_v17, 1  ;;  %v269_v22 = vadd.f32 %v268_v18, %v267_v14  ;;  %v280_v23 = vrot.slane %v279_v19, 1  ;;  %v289_v24 = vadd.f32 %v288_v20, %v287_v16 }
  0x40   : > { %v261_v25 = vadd.f32 %v260_v21, %v259_v17  ;;  %v270_v26 = vrot.slane %v269_v22, 1  ;;  %v281_v27 = vadd.f32 %v280_v23, %v279_v19  ;;  %v290_v28 = vrot.slane %v289_v24, 1 }
  0x42   : > { %262 = vst [vmem:[%s551_s19] sm:$0x1] %v261_v25  ;;  %v271_v29 = vadd.f32 %v270_v26, %v269_v22  ;;  %282 = vst [vmem:[%s551_s19 + $0x2] sm:$0x1] %v281_v27  ;;  %v291_v30 = vadd.f32 %v290_v28, %v289_v24 }
  0x44   : > { %272 = vst [vmem:[%s551_s19 + $0x1] sm:$0x1] %v271_v29  ;;  %292 = vst [vmem:[%s551_s19 + $0x3] sm:$0x1] %v291_v30 }
  0x45 PF: > { %s11_s10 = sadd.s32 1, %s501_s10   ;;  %s579_s6 = smov %s493_s8 }
  0x46   : > { %p8_p9 = scmp.ge.s32.totalorder %s11_s10, 6   ;;  %s580_s7 = smov %s497_s9 }
  0x47   : > { %s581_s8 = smov %s584_s11  ;;  %s582_s9 = smov %s588_s12 }
  0x48   :  { %10 = sbr.rel (!%p8_p9) target bundleno = 3 (0x3), region = 62 }

</bundles_post_ra>
